<compile_context>
chip_gen: v6e
topology: v6e:2x2x1
jax: 0.10.0
libtpu: 0.0.40
codegen_flags: <defaults>
</compile_context>

<pallas_src>
import functools

import jax
import jax.numpy as jnp
from jax.experimental import pallas as pl
from jax.experimental.pallas import tpu as pltpu


# ~128 M-rows already saturate the v5e MXU and are a good floor everywhere;
# bump toward 256 on v6e/v7x if B is large enough.
_TARGET_M_ROWS = 128


def _pick_tb(B, H):
    """Batch-tile size: largest divisor of B with TB*H <= target M rows,
    preferring a grid length >= 2 so the 'parallel' axis can still split
    across the two TensorCores on v7x."""
    cap = max(1, _TARGET_M_ROWS // max(H, 1))
    divisors = [d for d in range(1, min(B, cap) + 1) if B % d == 0]
    multi_step = [d for d in divisors if B // d >= 2]
    return max(multi_step) if multi_step else max(divisors)


def _build_toeplitz(conv_w, W, C):
    """Stacked band-Toeplitz for the 7x7 conv, shape (7*2*W, W), bfloat16.

    Row r = dy*2W + c*W + j holds K'[c, dy, j - w + 3] at column w (zero
    outside the 7-tap horizontal window), i.e. horizontal padding=3 is baked
    into the matrix.  K'[avg] is pre-scaled by 1/C so the kernel can feed a
    channel *sum* instead of a mean.
    """
    k = conv_w[0].astype(jnp.float32)                           # (2, 7, 7)
    k = k * jnp.array([1.0 / C, 1.0], jnp.float32)[:, None, None]
    j = jnp.arange(W)[:, None]                                  # band column
    w = jnp.arange(W)[None, :]                                  # output column
    dx = j - w + 3                                              # horizontal tap
    valid = (dx >= 0) & (dx < 7)
    t = jnp.where(valid[None, None], k[:, :, jnp.clip(dx, 0, 6)], 0.0)  # (2,7,W,W)
    t = jnp.transpose(t, (1, 0, 2, 3)).reshape(7 * 2 * W, W)    # (dy, c)-major
    return t.astype(jnp.bfloat16)


def _spatial_attention_kernel(x_ref, t_ref, o_ref, pad_ref, *, H, W):
    TB = x_ref.shape[0]
    x = x_ref[...].astype(jnp.float32)                   # (TB, C, H, W)

    # Channel pooling over a leading (non-lane/sublane) axis: pure VPU work.
    sum_map = jnp.sum(x, axis=1)                         # (TB, H, W); 1/C is in T
    max_map = jnp.max(x, axis=1)                         # (TB, H, W)
    maps = jnp.concatenate([sum_map, max_map], axis=-1)  # (TB, H, 2W) [sum|max]

    # Vertically padded scratch: only 3 top + 3 bottom zero rows remain
    # (horizontal padding lives in the Toeplitz).  Re-zeroed every step so the
    # kernel stays correct when the "parallel" axis is split across cores.
    pad_ref[:, 0:3, :] = jnp.zeros((TB, 3, 2 * W), jnp.float32)
    pad_ref[:, 3 + H:6 + H, :] = jnp.zeros((TB, 3, 2 * W), jnp.float32)
    pad_ref[:, 3:3 + H, :] = maps

    # im2row band: lane group dy holds the maps at vertical tap dy.
    band = jnp.concatenate([pad_ref[:, dy:dy + H, :] for dy in range(7)],
                           axis=-1)                      # (TB, H, 14W)
    band = band.reshape(TB * H, 14 * W).astype(jnp.bfloat16)

    # Entire 7x7 conv (2 channels x 49 taps + horizontal padding) as a single
    # bf16 MXU matmul with f32 accumulation: M = TB*H, K = 14W, N = W.
    acc = jnp.dot(band, t_ref[...], preferred_element_type=jnp.float32)

    o_ref[...] = jax.nn.sigmoid(acc).reshape(TB, H, W).astype(o_ref.dtype)


@jax.jit
def spatial_attention(x, conv_w):
    """x: (B, C, H, W) float32; conv_w: (1, 2, 7, 7) PyTorch Conv2d weight."""
    B, C, H, W = x.shape
    TB = _pick_tb(B, H)
    t = _build_toeplitz(conv_w, W, C)                    # (14W, W) bf16
    kernel = functools.partial(_spatial_attention_kernel, H=H, W=W)
    out = pl.pallas_call(
        kernel,
        out_shape=jax.ShapeDtypeStruct((B, H, W), jnp.float32),
        grid=(B // TB,),
        in_specs=[
            pl.BlockSpec((TB, C, H, W), lambda b: (b, 0, 0, 0)),
            pl.BlockSpec((7 * 2 * W, W), lambda b: (0, 0)),
        ],
        out_specs=pl.BlockSpec((TB, H, W), lambda b: (b, 0, 0)),
        scratch_shapes=[pltpu.VMEM((TB, H + 6, 2 * W), jnp.float32)],
        compiler_params=pltpu.CompilerParams(
            dimension_semantics=("parallel",)),
    )(x, t)
    return out[:, None, :, :]                            # (B, 1, H, W)


if __name__ == "__main__":
    key = jax.random.PRNGKey(0)
    kx, kw = jax.random.split(key)
    B, C, H, W = 2, 4, 16, 16
    x = jax.random.normal(kx, (B, C, H, W), jnp.float32)
    # nn.Conv2d(2, 1, kernel_size=7, padding=3, bias=False).weight
    conv_w = 0.1 * jax.random.normal(kw, (1, 2, 7, 7), jnp.float32)

    out = jax.block_until_ready(spatial_attention(x, conv_w))
    assert out.shape == (B, 1, H, W) and out.dtype == jnp.float32

    # Pure-XLA reference of the PyTorch forward (semantics check).
    avg = jnp.mean(x, axis=1, keepdims=True)
    mx = jnp.max(x, axis=1, keepdims=True)
    ref = jax.lax.conv_general_dilated(
        jnp.concatenate([avg, mx], axis=1), conv_w, (1, 1), ((3, 3), (3, 3)),
        dimension_numbers=("NCHW", "OIHW", "NCHW"),
        precision=jax.lax.Precision.HIGHEST)
    ref = jax.nn.sigmoid(ref)
    # bf16 matmul operands with f32 accumulation: allow a few 1e-3 of slack
    # (any structural/tap-index error would show up as >= 1e-2).
    err = float(jnp.max(jnp.abs(out - ref)))
    assert err < 5e-3, err

    print("KERNEL_OK")
</pallas_src>

<mosaic_0001>
module attributes {stable_mosaic.version = 11 : i64} {
  func.func @_spatial_attention_kernel(%arg0: i32, %arg1: memref<1x4x16x16xf32, #tpu.memory_space<vmem>>, %arg2: memref<224x16xbf16, #tpu.memory_space<vmem>>, %arg3: memref<1x16x16xf32, #tpu.memory_space<vmem>>, %arg4: memref<1x22x32xf32, #tpu.memory_space<vmem>>) attributes {dimension_semantics = [#tpu.dimension_semantics<parallel>], iteration_bounds = array<i64: 2>, scalar_prefetch = 0 : i64, scratch_operands = 1 : i64, tpu.core_type = #tpu.core_type<tc>, window_params = [{transform_indices = @transform_0, window_bounds = array<i64: 1, 4, 16, 16>}, {pipeline_mode = #tpu.pipeline_mode<synchronous>, transform_indices = @transform_1, window_bounds = array<i64: 224, 16>}, {transform_indices = @transform_2, window_bounds = array<i64: 1, 16, 16>}]} {
    %c0 = arith.constant 0 : index
    %c0_0 = arith.constant 0 : index
    %c0_1 = arith.constant 0 : index
    %c0_2 = arith.constant 0 : index
    %0 = vector.load %arg1[%c0, %c0_0, %c0_1, %c0_2] : memref<1x4x16x16xf32, #tpu.memory_space<vmem>>, vector<1x4x16x16xf32>
    %cst = arith.constant dense<0.000000e+00> : vector<1x16x16xf32>
    %1 = vector.multi_reduction <add>, %0, %cst [1] : vector<1x4x16x16xf32> to vector<1x16x16xf32>
    %cst_3 = arith.constant dense<0xFF800000> : vector<1x16x16xf32>
    %2 = vector.multi_reduction <maximumf>, %0, %cst_3 [1] : vector<1x4x16x16xf32> to vector<1x16x16xf32>
    %3 = tpu.concatenate %1, %2 in 2 : vector<1x16x16xf32>, vector<1x16x16xf32> -> vector<1x16x32xf32>
    %cst_4 = arith.constant 0.000000e+00 : f32
    %4 = vector.broadcast %cst_4 : f32 to vector<1x3x32xf32>
    %c0_5 = arith.constant 0 : index
    %c0_6 = arith.constant 0 : index
    %c0_7 = arith.constant 0 : index
    %5 = vector.load %arg4[%c0_5, %c0_6, %c0_7] : memref<1x22x32xf32, #tpu.memory_space<vmem>>, vector<1x3x32xf32>
    tpu.vector_store %arg4[%c0_5, %c0_6, %c0_7], %4 {strides = array<i32>} : memref<1x22x32xf32, #tpu.memory_space<vmem>>, vector<1x3x32xf32>,
    %cst_8 = arith.constant 0.000000e+00 : f32
    %6 = vector.broadcast %cst_8 : f32 to vector<1x3x32xf32>
    %c0_9 = arith.constant 0 : index
    %c19 = arith.constant 19 : index
    %c0_10 = arith.constant 0 : index
    %7 = vector.load %arg4[%c0_9, %c19, %c0_10] : memref<1x22x32xf32, #tpu.memory_space<vmem>>, vector<1x3x32xf32>
    tpu.vector_store %arg4[%c0_9, %c19, %c0_10], %6 {strides = array<i32>} : memref<1x22x32xf32, #tpu.memory_space<vmem>>, vector<1x3x32xf32>,
    %c0_11 = arith.constant 0 : index
    %c3 = arith.constant 3 : index
    %c0_12 = arith.constant 0 : index
    %8 = vector.load %arg4[%c0_11, %c3, %c0_12] : memref<1x22x32xf32, #tpu.memory_space<vmem>>, vector<1x16x32xf32>
    tpu.vector_store %arg4[%c0_11, %c3, %c0_12], %3 {strides = array<i32>} : memref<1x22x32xf32, #tpu.memory_space<vmem>>, vector<1x16x32xf32>,
    %c0_13 = arith.constant 0 : index
    %c0_14 = arith.constant 0 : index
    %c0_15 = arith.constant 0 : index
    %9 = vector.load %arg4[%c0_13, %c0_14, %c0_15] : memref<1x22x32xf32, #tpu.memory_space<vmem>>, vector<1x16x32xf32>
    %c0_16 = arith.constant 0 : index
    %c1 = arith.constant 1 : index
    %c0_17 = arith.constant 0 : index
    %10 = vector.load %arg4[%c0_16, %c1, %c0_17] : memref<1x22x32xf32, #tpu.memory_space<vmem>>, vector<1x16x32xf32>
    %c0_18 = arith.constant 0 : index
    %c2 = arith.constant 2 : index
    %c0_19 = arith.constant 0 : index
    %11 = vector.load %arg4[%c0_18, %c2, %c0_19] : memref<1x22x32xf32, #tpu.memory_space<vmem>>, vector<1x16x32xf32>
    %c0_20 = arith.constant 0 : index
    %c3_21 = arith.constant 3 : index
    %c0_22 = arith.constant 0 : index
    %12 = vector.load %arg4[%c0_20, %c3_21, %c0_22] : memref<1x22x32xf32, #tpu.memory_space<vmem>>, vector<1x16x32xf32>
    %c0_23 = arith.constant 0 : index
    %c4 = arith.constant 4 : index
    %c0_24 = arith.constant 0 : index
    %13 = vector.load %arg4[%c0_23, %c4, %c0_24] : memref<1x22x32xf32, #tpu.memory_space<vmem>>, vector<1x16x32xf32>
    %c0_25 = arith.constant 0 : index
    %c5 = arith.constant 5 : index
    %c0_26 = arith.constant 0 : index
    %14 = vector.load %arg4[%c0_25, %c5, %c0_26] : memref<1x22x32xf32, #tpu.memory_space<vmem>>, vector<1x16x32xf32>
    %c0_27 = arith.constant 0 : index
    %c6 = arith.constant 6 : index
    %c0_28 = arith.constant 0 : index
    %15 = vector.load %arg4[%c0_27, %c6, %c0_28] : memref<1x22x32xf32, #tpu.memory_space<vmem>>, vector<1x16x32xf32>
    %16 = tpu.concatenate %9, %10, %11, %12, %13, %14, %15 in 2 : vector<1x16x32xf32>, vector<1x16x32xf32>, vector<1x16x32xf32>, vector<1x16x32xf32>, vector<1x16x32xf32>, vector<1x16x32xf32>, vector<1x16x32xf32> -> vector<1x16x224xf32>
    %17 = vector.shape_cast %16 : vector<1x16x224xf32> to vector<16x224xf32>
    %18 = arith.truncf %17 : vector<16x224xf32> to vector<16x224xbf16>
    %c0_29 = arith.constant 0 : index
    %c0_30 = arith.constant 0 : index
    %19 = vector.load %arg2[%c0_29, %c0_30] : memref<224x16xbf16, #tpu.memory_space<vmem>>, vector<224x16xbf16>
    %cst_31 = arith.constant dense<0.000000e+00> : vector<16x16xf32>
    %20 = tpu.matmul %18, %19, %cst_31 {dimension_numbers = #tpu.dot_dimension_numbers<[1], [0], [0], [1], [0, 0, 1, 1], [], []>} : vector<16x224xbf16>, vector<224x16xbf16>, vector<16x16xf32> -> vector<16x16xf32>
    %21 = arith.negf %20 : vector<16x16xf32>
    %22 = math.exp %21 : vector<16x16xf32>
    %cst_32 = arith.constant 1.000000e+00 : f32
    %23 = vector.broadcast %cst_32 : f32 to vector<16x16xf32>
    %24 = arith.addf %23, %22 : vector<16x16xf32>
    %25 = arith.divf %23, %24 : vector<16x16xf32>
    %26 = vector.shape_cast %25 : vector<16x16xf32> to vector<1x16x16xf32>
    %c0_33 = arith.constant 0 : index
    %c0_34 = arith.constant 0 : index
    %c0_35 = arith.constant 0 : index
    %27 = vector.load %arg3[%c0_33, %c0_34, %c0_35] : memref<1x16x16xf32, #tpu.memory_space<vmem>>, vector<1x16x16xf32>
    tpu.vector_store %arg3[%c0_33, %c0_34, %c0_35], %26 {strides = array<i32>} : memref<1x16x16xf32, #tpu.memory_space<vmem>>, vector<1x16x16xf32>,
    return
  }
  func.func @transform_0(%arg0: i32) -> (i32, i32, i32, i32) {
    %c0_i32 = arith.constant 0 : i32
    %c0_i32_0 = arith.constant 0 : i32
    %c0_i32_1 = arith.constant 0 : i32
    %c0_i32_2 = arith.constant 0 : i32
    return %arg0, %c0_i32, %c0_i32_0, %c0_i32_1 : i32, i32, i32, i32
  }
  func.func @transform_1(%arg0: i32) -> (i32, i32) {
    %c0_i32 = arith.constant 0 : i32
    %c0_i32_0 = arith.constant 0 : i32
    %c0_i32_1 = arith.constant 0 : i32
    return %c0_i32, %c0_i32_0 : i32, i32
  }
  func.func @transform_2(%arg0: i32) -> (i32, i32, i32) {
    %c0_i32 = arith.constant 0 : i32
    %c0_i32_0 = arith.constant 0 : i32
    %c0_i32_1 = arith.constant 0 : i32
    return %arg0, %c0_i32, %c0_i32_0 : i32, i32, i32
  }
}

</mosaic_0001>

<bundles_post_ra>
// kernel: spatial_attention.1
= control target key start
LH: loop header
LB: loop body
LE: loop exit
PB: predicated region body
PF: predicated region fallthrough
CT: control target
= control target key end

     0   :  { %7 = vsyncpa [#allocation4], 0  ;;  %s898_s0 = inlined_call_operand.vmem [shape: f32[2,4,16,16], index: 0, kind: input, shape index: {}]   ;;  %s899_s1 = inlined_call_operand.vmem [shape: bf16[224,16], index: 1, kind: input, shape index: {}]   ;;  %s900_s2 = inlined_call_operand.hbm [shape: f32[2,16,16], index: 2, kind: output, shape index: {}]  }
   0x1   :  { %9 = vsyncpa [#allocation4 + $0x1], 0  ;;  %s721_s9 = smov 0   ;;  %s723_s10 = smov 0  }
   0x2   :  { %s725_s11 = smov 0   ;;  %s727_s12 = smov 0  }
   0x3 LB: > { %s742_s13 = sadd.s32 4294967295, %s695_s12   ;;  %s510_s14 = sadd.s32 4294967294, %s695_s12   ;;  %s695_s12 = sphi %s727_s12, %s906_s12   ;;  %s691_s11 = sphi %s725_s11, %s905_s11   ;;  %s687_s10 = sphi %s723_s10, %s904_s10   ;;  %s683_s9 = sphi %s721_s9, %s903_s9  }
   0x4   : > { %s746_s15 = sadd.s32 1, %s695_s12   ;;  %s69_s16 = sadd.s32 1, %s691_s11 }
   0x5   : > { %s66_s17 = ssub.s32 %s695_s12, %s746_s15  ;;  %p79_p0 = scmp.ne.s32.totalorder %s691_s11, %s687_s10 }
   0x6   : > { %p67_p1 = scmp.eq.s32.totalorder %s66_s17, 0  ;;  %p80_p2 = scmp.eq.s32.totalorder %s742_s13, 1 }
   0x7   : > { %p85_p3 = scmp.ne.s32.totalorder %s687_s10, %s683_s9  ;;  %p86_p4 = scmp.eq.s32.totalorder %s510_s14, 1 }
   0x8   : > { %s757_s18 = scalar_select %p67_p1, %s691_s11, %s69_s16  }
   0x9   : > { %p759_p5 = por %p80_p2, %p79_p0  ;;  %p763_p6 = por %p86_p4, %p85_p3 }
   0xa   : > { %p513_p7 = scmp.ge.s32.totalorder %s695_s12, 1  ;;  %p115_p8 = scmp.lt.s32.totalorder %s695_s12, 3 }
   0xc   : > { %p116_p9 = pnand %p513_p7, %p115_p8 }
   0xd   : > { %p137_p10 = scmp.lt.s32.totalorder (!%p116_p9), %s742_s13, 1  ;;  %s698_s26 = smov (!%p116_p9), 16  }
   0xe   : > { %119 = sbr.rel (%p116_p9) target bundleno = 533 (0x215), region = 28  ;;  %s700_s8 = smov (!%p116_p9), 64  }
   0xf   : > { %s701_s14 = smov (!%p116_p9), 32   ;;  %s702_s16 = smov (!%p116_p9), 96  }
  0x10   : > { %s134_s17 = sand.u32 (!%p116_p9), 1, %s687_s10   ;;  %s703_s29 = smov (!%p116_p9), [#allocation3]  }
  0x11   : > { %s858_s28 = scalar_lea.sflag (!%p116_p9), [#allocation4], %s134_s17  ;;  %s639_s30 = sshll.u32 (!%p116_p9), %s703_s29, 4  ;;  %s640_s30 = int_to_ptr.vmem [resolvable:$false] %s639_s30 }
  0x12   : > { %s641_s3 = scalar_lea.vmem (!%p116_p9), %s640_s30, 512 }
  0x13   : > { %vm190_vm0 = vcmask 256000   ;;  %v697_v0 = vmov 0.0   ;;  %s138_s21 = scalar_select %p137_p10, %s742_s13, 1  ;;  %vm151_vm1 = vcmask 130048   ;;  %v613_v37 = vld [vmem:[%s899_s1 + $0x38] sm:$0xff]   ;;  %v699_v38 = vmov 0  }
  0x14   : > { %191 = vst.msk [vmem:[#allocation2] sm:$0x7] %vm190_vm0, %v697_v0  ;;  %192 = vst.msk [vmem:[#allocation2 + $0x13] sm:$0x7] %vm190_vm0, %v697_v0  ;;  %379 = vmatprep.subr.bf16.mxu0 %v699_v38  ;;  %v614_v39 = vld [vmem:[%s899_s1 + $0x30] sm:$0xff]   ;;  %v615_v40 = vld [vmem:[%s899_s1 + $0x28] sm:$0xff]  }
  0x15   : > { %s539_s22 = sshll.u32 %s138_s21, 6  ;;  %380 = vmatpush1.bf16.msra.mxu0 %v613_v37  ;;  %v616_v41 = vld [vmem:[%s899_s1 + $0x20] sm:$0xff]   ;;  %v617_v42 = vld [vmem:[%s899_s1 + $0x18] sm:$0xff]   ;;  %v618_v43 = vld [vmem:[%s899_s1 + $0x10] sm:$0xff]   ;;  %vm193_vm2 = vcmask 261120   ;;  %vm252_vm3 = vcmask 523264  }
  0x16   : > { %s141_s25 = scalar_lea.vmem %s898_s0, %s539_s22  ;;  %381 = vmatprep.subr.bf16.mxu0 %v699_v38  ;;  %v619_v44 = vld [vmem:[%s899_s1 + $0x8] sm:$0xff]   ;;  %v620_v45 = vld [vmem:[%s899_s1] sm:$0xff]   ;;  %v623_v48 = vld [vmem:[%s899_s1 + $0x58] sm:$0xff]   ;;  %vm255_vm4 = vcmask 785408   ;;  %s514_s21 = sshll.u32 %s134_s17, 4 }
  0x17   : > { %v143_v1 = vld [vmem:[%s141_s25] sm:$0xff]  ;;  %v145_v2 = vld [vmem:[%s141_s25 + $0x10] sm:$0xff]  ;;  %v144_v9 = vld [vmem:[%s141_s25 + $0x8] sm:$0xff]  ;;  %s540_s22 = sshll.u32 %s742_s13, 8  ;;  %s136_s23 = scalar_lea.vmem [#allocation3], %s514_s21 }
  0x18   : > { %v147_v3 = vld [vmem:[%s141_s25 + $0x20] sm:$0xff]  ;;  %v149_v4 = vld [vmem:[%s141_s25 + $0x30] sm:$0xff]  ;;  %v153_v5 = vsel %vm151_vm1, %v145_v2, 0.0  ;;  %v166_v7 = vsel %vm151_vm1, %v143_v1, -inf  ;;  %v167_v8 = vsel %vm151_vm1, %v145_v2, -inf  ;;  %v152_v13 = vsel %vm151_vm1, %v143_v1, 0.0  ;;  %s853_s27 = scalar_lea.hbm %s900_s2, %s540_s22 }
  0x19   : > { %v155_v6 = vsel %vm151_vm1, %v147_v3, 0.0  ;;  %v157_v10 = vsel %vm151_vm1, %v149_v4, 0.0  ;;  %v168_v11 = vsel %vm151_vm1, %v147_v3, -inf  ;;  %v170_v12 = vsel %vm151_vm1, %v149_v4, -inf  ;;  %v146_v14 = vld [vmem:[%s141_s25 + $0x18] sm:$0xff]  ;;  %v148_v15 = vld [vmem:[%s141_s25 + $0x28] sm:$0xff]  ;;  %382 = vmatpush1.bf16.msra.mxu0 %v614_v39 }
  0x1a   : > { %v169_v16 = vmax.f32 %v166_v7, %v168_v11  ;;  %v171_v17 = vmax.f32 %v167_v8, %v170_v12  ;;  %v154_v18 = vadd.f32 %v153_v5, %v152_v13  ;;  %v150_v19 = vld [vmem:[%s141_s25 + $0x38] sm:$0xff]  ;;  %v159_v20 = vsel %vm151_vm1, %v144_v9, 0.0  ;;  %383 = vmatprep.subr.bf16.mxu0 %v699_v38  ;;  %v621_v46 = vld [vmem:[%s899_s1 + $0x68] sm:$0xff]   ;;  %v622_v47 = vld [vmem:[%s899_s1 + $0x60] sm:$0xff]   ;;  %s448_s24 = sshll.u32 %s136_s23, 4  ;;  %s855_s24 = int_to_ptr.vmem [resolvable:$true] %s448_s24 }
  0x1b   : > { %v160_v21 = vsel %vm151_vm1, %v146_v14, 0.0  ;;  %v162_v22 = vsel %vm151_vm1, %v148_v15, 0.0  ;;  %v173_v23 = vsel %vm151_vm1, %v144_v9, -inf  ;;  %v174_v24 = vsel %vm151_vm1, %v146_v14, -inf  ;;  %v624_v53 = vld [vmem:[%s899_s1 + $0x50] sm:$0xff]   ;;  %v625_v54 = vld [vmem:[%s899_s1 + $0x48] sm:$0xff]   ;;  %p642_p0 = scmp.lt.s32.totalorder %s855_s24, %s640_s30 }
  0x1c   : > { %v172_v25 = vmax.f32 %v169_v16, %v171_v17  ;;  %v156_v26 = vadd.f32 %v155_v6, %v154_v18  ;;  %v161_v27 = vadd.f32 %v160_v21, %v159_v20  ;;  %v175_v28 = vsel %vm151_vm1, %v148_v15, -inf  ;;  %v626_v55 = vld [vmem:[%s899_s1 + $0x40] sm:$0xff]   ;;  %s635_s13 = scalar_lea.vmem %s855_s24, 256 }
  0x1d   : > { %v176_v29 = vmax.f32 %v173_v23, %v175_v28  ;;  %v177_v30 = vsel %vm151_vm1, %v150_v19, -inf  ;;  %v164_v31 = vsel %vm151_vm1, %v150_v19, 0.0  ;;  %384 = vmatpush1.bf16.msra.mxu0 %v615_v40  ;;  %p636_p11 = scmp.ne.s32.totalorder %s855_s24, %s635_s13  ;;  %p643_p1 = scmp.lt.s32.totalorder %s641_s3, %s635_s13 }
  0x1e   : > { %182 = vrot.lane.b32.xlu0 %v172_v25, %s698_s26  ;;  %v178_v32 = vmax.f32 %v174_v24, %v177_v30  ;;  %v158_v33 = vadd.f32 %v157_v10, %v156_v26  ;;  %v163_v34 = vadd.f32 %v162_v22, %v161_v27  ;;  %385 = vmatprep.subr.bf16.mxu0 %v699_v38 }
  0x1f   : > { %p637_p12 = pnand %p636_p11, %p759_p5  ;;  %p644_p2 = por %p643_p1, %p642_p0 }
  0x20   : > { %v179_v35 = vmax.f32 %v176_v29, %v178_v32  ;;  %v165_v36 = vadd.f32 %v164_v31, %v163_v34 }
  0x21   : > { %386 = vmatpush1.bf16.msra.mxu0 %v616_v41  ;;  %p638_p13 = pneg %p637_p12 }
  0x22   : > { %184 = vrot.lane.b32.xlu0 %v179_v35, %s698_s26  ;;  %387 = vmatprep.subr.bf16.mxu0 %v699_v38 }
  0x23   : > { %p645_p3 = pnand %p644_p2, %p638_p13 }
  0x25   : > { %388 = vmatpush1.bf16.msra.mxu0 %v617_v42 }
  0x26   : > { %389 = vmatprep.subr.bf16.mxu0 %v699_v38 }
  0x29   : > { %390 = vmatpush1.bf16.msra.mxu0 %v618_v43 }
  0x2a   : > { %391 = vmatprep.subr.bf16.mxu0 %v699_v38 }
  0x2d   : > { %392 = vmatpush1.bf16.msra.mxu0 %v619_v44 }
  0x2e   : > { %393 = vmatprep.subr.bf16.mxu0 %v699_v38 }
  0x31   : > { %394 = vmatpush1.bf16.msra.mxu0 %v620_v45 }
  0x32   : > { %399 = vmatprep.subr.bf16.mxu0 %v699_v38 }
  0x35   : > { %400 = vmatpush2.bf16.msra.mxu0 %v621_v46 }
  0x36   : > { %401 = vmatprep.subr.bf16.mxu0 %v699_v38 }
  0x39   : > { %402 = vmatpush2.bf16.msra.mxu0 %v622_v47 }
  0x3a   : > { %403 = vmatprep.subr.bf16.mxu0 %v699_v38 }
  0x3d   : > { %404 = vmatpush2.bf16.msra.mxu0 %v623_v48 }
  0x3e   : > { %405 = vmatprep.subr.bf16.mxu0 %v699_v38 }
  0x41   : > { %406 = vmatpush2.bf16.msra.mxu0 %v624_v53 }
  0x42   : > { %407 = vmatprep.subr.bf16.mxu0 %v699_v38 }
  0x45   : > { %408 = vmatpush2.bf16.msra.mxu0 %v625_v54 }
  0x46   : > { %409 = vmatprep.subr.bf16.mxu0 %v699_v38 }
  0x49   : > { %410 = vmatpush2.bf16.msra.mxu0 %v626_v55 }
  0x90   : > { %v183_v49 = vpop.permute.xlu0 %182 }
  0x91   : > { %v188_v50 = vsel %vm151_vm1, %v158_v33, %v183_v49 }
  0x92   : > { %194 = vst.msk [vmem:[#allocation2 + $0x3] sm:$0xff] %vm193_vm2, %v188_v50 }
  0x94   : > { %v185_v51 = vpop.permute.xlu0 %184 }
  0x95   : > { %v189_v52 = vsel %vm151_vm1, %v165_v36, %v185_v51 }
  0x96   : > { %195 = vst.msk [vmem:[#allocation2 + $0xb] sm:$0xff] %vm193_vm2, %v189_v52 }
  0x99   : > { %v200_v56 = vld [vmem:[#allocation2 + $0x2] sm:$0xff] }
  0x9a   : > { %v198_v58 = vld [vmem:[#allocation2 + $0x1] sm:$0xff] }
  0x9b   : > { %v202_v1 = vld [vmem:[#allocation2 + $0x3] sm:$0xff] }
  0x9c   : > { %v196_v11 = vld [vmem:[#allocation2] sm:$0xff] }
  0x9d   : > { %v201_v57 = vld [vmem:[#allocation2 + $0xa] sm:$0xff] }
  0x9e   : > { %v199_v59 = vld [vmem:[#allocation2 + $0x9] sm:$0xff]  ;;  %v598_v60 = vpack.i.bf16 %v201_v57, %v200_v56 }
  0x9f   : > { %v588_v61 = vpack.i.bf16 %v199_v59, %v198_v58  ;;  %v203_v62 = vld [vmem:[#allocation2 + $0xb] sm:$0xff] }
  0xa0   : > { %v206_v63 = vld [vmem:[#allocation2 + $0x5] sm:$0xff]  ;;  %v207_v0 = vld [vmem:[#allocation2 + $0xd] sm:$0xff]  ;;  %599 = vrot.lane.b32.xlu0 %v598_v60, %s700_s8  ;;  %v608_v2 = vpack.i.bf16 %v203_v62, %v202_v1 }
  0xa1   : > { %589 = vrot.lane.b32.xlu1 %v588_v61, %s701_s14  ;;  %v593_v3 = vpack.i.bf16 %v207_v0, %v206_v63  ;;  %v208_v4 = vld [vmem:[#allocation2 + $0x6] sm:$0xff]  ;;  %v209_v5 = vld [vmem:[#allocation2 + $0xe] sm:$0xff] }
  0xa2   : > { %v603_v6 = vpack.i.bf16 %v209_v5, %v208_v4  ;;  %v197_v12 = vld [vmem:[#allocation2 + $0x8] sm:$0xff] }
  0xa3   : > { %v204_v26 = vld [vmem:[#allocation2 + $0x4] sm:$0xff]  ;;  %v205_v27 = vld [vmem:[#allocation2 + $0xc] sm:$0xff] }
  0xa4   : > { %609 = vrot.lane.b32.xlu0 %v608_v2, %s702_s16 }
  0xa5   : > { %594 = vrot.lane.b32.xlu1 %v593_v3, %s701_s14 }
  0xa9   : > { %604 = vrot.lane.b32.xlu1 %v603_v6, %s700_s8 }
 0x112   : > { %v600_v7 = vpop.permute.xlu0 %599 }
 0x113   : > { %v590_v8 = vpop.permute.xlu1 %589  ;;  %v602_v15 = vunpack.i.h.bf16 %v600_v7  ;;  %v601_v16 = vunpack.i.l.bf16 %v600_v7 }
 0x114   : > { %v592_v9 = vunpack.i.h.bf16 %v590_v8  ;;  %v591_v10 = vunpack.i.l.bf16 %v590_v8 }
 0x116   : > { %v610_v13 = vpop.permute.xlu0 %609  ;;  %v250_v17 = vsel %vm193_vm2, %v196_v11, %v591_v10  ;;  %v251_v18 = vsel %vm193_vm2, %v197_v12, %v592_v9 }
 0x117   : > { %v595_v14 = vpop.permute.xlu1 %594  ;;  %v612_v19 = vunpack.i.h.bf16 %v610_v13  ;;  %v611_v20 = vunpack.i.l.bf16 %v610_v13  ;;  %v253_v28 = vsel %vm252_vm3, %v250_v17, %v601_v16  ;;  %v254_v29 = vsel %vm252_vm3, %v251_v18, %v602_v15 }
 0x118   : > { %v597_v21 = vunpack.i.h.bf16 %v595_v14  ;;  %v596_v22 = vunpack.i.l.bf16 %v595_v14 }
 0x119   : > { %v256_v30 = vsel %vm255_vm4, %v253_v28, %v611_v20  ;;  %v257_v31 = vsel %vm255_vm4, %v254_v29, %v612_v19 }
 0x11a   : > { %v258_v32 = vsel %vm193_vm2, %v204_v26, %v596_v22  ;;  %v259_v33 = vsel %vm193_vm2, %v205_v27, %v597_v21  ;;  %v262_v37 = vpack.c.bf16 %v257_v31, %v256_v30 }
 0x11b   : > { %v605_v23 = vpop.permute.xlu1 %604 }
 0x11c   : > { %v607_v24 = vunpack.i.h.bf16 %v605_v23  ;;  %v606_v25 = vunpack.i.l.bf16 %v605_v23 }
 0x11e   : > { %v260_v34 = vsel %vm252_vm3, %v258_v32, %v606_v25  ;;  %v261_v35 = vsel %vm252_vm3, %v259_v33, %v607_v24 }
 0x11f   : > { %v263_v36 = vpack.c.bf16 %v261_v35, %v260_v34 }
 0x121   : > { %531 = vmatprep.mubr.msk.bf16.mxu0 %vm255_vm4, %v263_v36 }
 0x122   : > { %412 = vmatmul.mubr.bf16.vlgmr.msra.gmra.mxu0 %v262_v37 }
 0x1e2   : > { %v413_v38 = vpop.f32.mrf.mxu0 }
 0x1e3   : > { %v532_v39 = vmul.f32 -1.442695, %v413_v38 }
 0x1e4   : > { %v415_v40 = vpop.f32.mrf.mxu0 }
 0x1e5   : > { %627 = vpow2.f32 %v532_v39 }
 0x1e6   : > { %v416_v41 = vpop.f32.mrf.mxu0 }
 0x1e7   : > { %v533_v42 = vmul.f32 -1.442695, %v416_v41 }
 0x1e8   : > { %v418_v43 = vpop.f32.mrf.mxu0 }
 0x1e9   : > { %629 = vpow2.f32 %v533_v42 }
 0x1f2   : > { %v628_v44 = vpop.eup %627 }
 0x1f3   : > { %v426_v45 = vadd.f32 1.0, %v628_v44 }
 0x1f5   : > { %631 = vrcp.f32 %v426_v45 }
 0x1f6   : > { %v630_v46 = vpop.eup %629 }
 0x1f7   : > { %v427_v47 = vadd.f32 1.0, %v630_v46 }
 0x1f9   : > { %633 = vrcp.f32 %v427_v47 }
 0x202   : > { %v632_v48 = vpop.eup %631 }
 0x203   : > { %432 = vst.msk [vmem:[%s136_s23] sm:$0xff] %vm151_vm1, %v632_v48 }
 0x206   : > { %v634_v49 = vpop.eup %633 }
 0x207   : > { %433 = vst.msk [vmem:[%s136_s23 + $0x8] sm:$0xff] %vm151_vm1, %v634_v49 }
 0x208   : > { %648 = shalt.err (!%p645_p3)
}
 0x209   : > { %s649_s4 = scalar_lea.hbm %s853_s27, 256  ;;  %s653_s7 = scalar_lea.hbm %s900_s2, 512 }
 0x20a   : > { %p650_p4 = scmp.ne.s32.totalorder %s853_s27, %s649_s4  ;;  %p654_p9 = scmp.lt.s32.totalorder %s853_s27, %s900_s2 }
 0x20b   : > { %p655_p10 = scmp.lt.s32.totalorder %s653_s7, %s649_s4 }
 0x20c   : > { %p651_p7 = pnand %p650_p4, %p759_p5 }
 0x20d   : > { %p656_p11 = por %p655_p10, %p654_p9 }
 0x20e   : > { %p652_p8 = pneg %p651_p7 }
 0x210   : > { %p657_p12 = pnand %p656_p11, %p652_p8 }
 0x212   : > { %660 = shalt.err (!%p657_p12)
}
 0x213   : > { %s704_s16 = smov 128   ;;  %s705_s17 = smov 8  }
 0x214   : > { %541 = dma.vmem_to_hbm [thread:$0]  (%p759_p5), %s855_s24, 256, %s853_s27, %s858_s28, %s704_s16, %s704_s16, %s705_s17  }
 0x215 PF: > { %p547_p13 = scmp.ge.s32.totalorder %s695_s12, 2  ;;  %s463_s21 = sand.u32 1, %s683_s9  }
 0x216   : > { %s464_s22 = scalar_lea.sflag [#allocation4], %s463_s21 }
 0x217   : > { %p544_p0 = pnand %p547_p13, %p763_p6 }
 0x219   : > { %p545_p1 = pneg %p544_p0 }
 0x21b   : > { %678 = dma.done.wait (%p545_p1), %s464_s22, 256  }
 0x21c   : > { %680 = vsyncadd (%p545_p1), %s464_s22, 4294967040  ;;  %p12_p2 = scmp.ge.s32.totalorder %s746_s15, 4   ;;  %s903_s9 = smov %s687_s10 }
 0x21d   : > { %s904_s10 = smov %s691_s11  ;;  %s905_s11 = smov %s757_s18 }
 0x21e   : > { %s906_s12 = smov %s746_s15  ;;  %14 = sbr.rel (!%p12_p2) target bundleno = 3 (0x3), region = 63 }
 0x223   :  { %469 = vsyncpa [#allocation4], 1 }
 0x224   :  { %471 = vsyncpa [#allocation4 + $0x1], 1 }

</bundles_post_ra>
